<compile_context>
chip_gen: v7x
topology: tpu7x:2x2x1
jax: 0.10.0
libtpu: 0.0.40
codegen_flags: <defaults>
</compile_context>

<pallas_src>
import jax
import jax.numpy as jnp
from jax import lax
from jax.experimental import pallas as pl
from jax.experimental.pallas import tpu as pltpu


def mlp_kernel(x_ref, w1_ref, b1_ref, w2_ref, b2_ref, w3_ref, b3_ref, o_ref):
    cdt = w1_ref.dtype                                     # matmul operand dtype
    x = x_ref[...]                                         # (TB, 11)
    # Linear(11, 64) + ReLU (f32 accumulation, f32 bias/ReLU)
    h1 = jnp.dot(x, w1_ref[...], preferred_element_type=jnp.float32)   # (TB, 64)
    h1 = jnp.maximum(h1 + b1_ref[...], 0.0)
    # Linear(64, 64) + ReLU
    h2 = jnp.dot(h1.astype(cdt), w2_ref[...],
                 preferred_element_type=jnp.float32)                   # (TB, 64)
    h2 = jnp.maximum(h2 + b2_ref[...], 0.0)
    # Linear(64, 1) as a transposed contraction: contract w3's dim 1 with h2's
    # dim 1 -> (1, TB).  No explicit h2.T, and the output store is lane-dense
    # (batch on the lane axis).
    y = lax.dot_general(
        w3_ref[...], h2.astype(cdt),
        dimension_numbers=(((1,), (1,)), ((), ())),
        preferred_element_type=jnp.float32,
    )                                                                   # (1, TB)
    o_ref[...] = (y + b3_ref[0, 0]).astype(o_ref.dtype)


def _round_up(n, m):
    return ((n + m - 1) // m) * m


def unit_cases_forward(x, params, *, tile_rows=2048, compute_dtype=jnp.float32):
    """x: (B, 11) float32 -> (B, 1) float32."""
    w1, b1, w2, b2, w3, b3 = params
    B, in_features = x.shape            # (B, 11)
    hidden = w1.shape[1]                # 64

    # Matmul operands in compute_dtype (bf16 option); biases/accum stay f32.
    x_c = x.astype(compute_dtype)
    w1_c = w1.astype(compute_dtype)
    w2_c = w2.astype(compute_dtype)
    w3_c = w3.astype(compute_dtype)

    # Batch tile: multiple of 128 (lane-dense output), capped at tile_rows.
    tb = min(int(tile_rows), _round_up(max(B, 1), 128))
    # No wrapper-side padding: ragged last block, OOB output lanes are dropped.
    grid = (pl.cdiv(B, tb),)

    itemsize = jnp.dtype(compute_dtype).itemsize
    weight_elems = in_features * hidden + hidden * hidden + hidden
    cost = pl.CostEstimate(
        flops=2 * B * (in_features * hidden + hidden * hidden + hidden),
        transcendentals=0,
        bytes_accessed=(B * in_features * itemsize      # x read
                        + B * 4                          # y write (f32)
                        + weight_elems * itemsize        # weights
                        + (2 * hidden + 1) * 4),         # biases (f32)
    )

    vmem = pltpu.MemorySpace.VMEM
    smem = pltpu.MemorySpace.SMEM

    out = pl.pallas_call(
        mlp_kernel,
        out_shape=jax.ShapeDtypeStruct((1, B), jnp.float32),
        grid=grid,
        in_specs=[
            # x: tiled over batch, auto-pipelined / double-buffered.
            pl.BlockSpec((tb, in_features), lambda i: (i, 0), memory_space=vmem),
            # weights / biases: constant index maps -> VMEM-resident across steps.
            pl.BlockSpec((in_features, hidden), lambda i: (0, 0), memory_space=vmem),
            pl.BlockSpec((1, hidden), lambda i: (0, 0), memory_space=vmem),
            pl.BlockSpec((hidden, hidden), lambda i: (0, 0), memory_space=vmem),
            pl.BlockSpec((1, hidden), lambda i: (0, 0), memory_space=vmem),
            pl.BlockSpec((1, hidden), lambda i: (0, 0), memory_space=vmem),
            # b3 is a single scalar -> SMEM.
            pl.BlockSpec(memory_space=smem),
        ],
        out_specs=pl.BlockSpec((1, tb), lambda i: (0, i), memory_space=vmem),
        compiler_params=pltpu.CompilerParams(
            dimension_semantics=("parallel",),
        ),
        cost_estimate=cost,
    )(x_c, w1_c, b1, w2_c, b2, w3_c, b3)

    # (1, B) lane-dense slab -> (B, 1)
    return out.reshape(B, 1)


def init_params(key):
    """Deterministic init matching nn.Linear defaults (uniform(+-1/sqrt(fan_in))).

    w1, w2 stored as (in, out); w3 stored as (out, in) = (1, 64) so the kernel's
    transposed final contraction produces a lane-dense row; b3 is (1, 1).
    """
    k1, k2, k3, k4, k5, k6 = jax.random.split(key, 6)

    def uniform(k, shape, fan_in):
        bound = 1.0 / jnp.sqrt(fan_in)
        return jax.random.uniform(k, shape, jnp.float32, -bound, bound)

    w1 = uniform(k1, (11, 64), 11)
    b1 = uniform(k2, (1, 64), 11)
    w2 = uniform(k3, (64, 64), 64)
    b2 = uniform(k4, (1, 64), 64)
    w3 = uniform(k5, (1, 64), 64)   # (out, in)
    b3 = uniform(k6, (1, 1), 64)
    return (w1, b1, w2, b2, w3, b3)


def reference_forward(x, params):
    w1, b1, w2, b2, w3, b3 = params
    h1 = jnp.maximum(x @ w1 + b1, 0.0)
    h2 = jnp.maximum(h1 @ w2 + b2, 0.0)
    return h2 @ w3.T + b3


if __name__ == "__main__":
    key = jax.random.PRNGKey(0)
    k_x, k_x2, k_p = jax.random.split(key, 3)
    params = init_params(k_p)

    # Small batch: single (ragged) grid step.
    B = 8
    x = jax.random.normal(k_x, (B, 11), dtype=jnp.float32)
    out = jax.block_until_ready(unit_cases_forward(x, params))
    ref = reference_forward(x, params)
    assert out.shape == (B, 1), out.shape
    assert jnp.allclose(out, ref, atol=1e-4, rtol=1e-4), "mismatch vs reference (B=8)"

    # Larger, non-divisible batch: multi-step tiled grid with a ragged last
    # block and no wrapper-side padding.
    B2 = 2500
    x2 = jax.random.normal(k_x2, (B2, 11), dtype=jnp.float32)
    out2 = jax.block_until_ready(unit_cases_forward(x2, params))
    ref2 = reference_forward(x2, params)
    assert out2.shape == (B2, 1), out2.shape
    assert jnp.allclose(out2, ref2, atol=1e-4, rtol=1e-4), "mismatch vs reference (B=2500)"

    # Optional bf16 matmul-operand path (f32 accumulation): looser tolerance.
    out3 = jax.block_until_ready(
        unit_cases_forward(x2, params, compute_dtype=jnp.bfloat16))
    assert out3.shape == (B2, 1), out3.shape
    assert jnp.allclose(out3, ref2, atol=5e-2, rtol=5e-2), "mismatch vs reference (bf16)"

    print("KERNEL_OK")
</pallas_src>

<mosaic_0001>
module attributes {stable_mosaic.version = 11 : i64} {
  func.func @mlp_kernel(%arg0: i32, %arg1: memref<128x11xf32, #tpu.memory_space<vmem>>, %arg2: memref<11x64xf32, #tpu.memory_space<vmem>>, %arg3: memref<1x64xf32, #tpu.memory_space<vmem>>, %arg4: memref<64x64xf32, #tpu.memory_space<vmem>>, %arg5: memref<1x64xf32, #tpu.memory_space<vmem>>, %arg6: memref<1x64xf32, #tpu.memory_space<vmem>>, %arg7: memref<1x1xf32, #tpu.memory_space<smem>>, %arg8: memref<1x128xf32, #tpu.memory_space<vmem>>) attributes {dimension_semantics = [#tpu.dimension_semantics<parallel>], iteration_bounds = array<i64: 1>, scalar_prefetch = 0 : i64, scratch_operands = 0 : i64, tpu.core_type = #tpu.core_type<tc>, window_params = [{transform_indices = @transform_0, window_bounds = array<i64: 128, 11>}, {pipeline_mode = #tpu.pipeline_mode<synchronous>, transform_indices = @transform_1, window_bounds = array<i64: 11, 64>}, {pipeline_mode = #tpu.pipeline_mode<synchronous>, transform_indices = @transform_2, window_bounds = array<i64: 1, 64>}, {pipeline_mode = #tpu.pipeline_mode<synchronous>, transform_indices = @transform_3, window_bounds = array<i64: 64, 64>}, {pipeline_mode = #tpu.pipeline_mode<synchronous>, transform_indices = @transform_4, window_bounds = array<i64: 1, 64>}, {pipeline_mode = #tpu.pipeline_mode<synchronous>, transform_indices = @transform_5, window_bounds = array<i64: 1, 64>}, {transform_indices = @transform_6, window_bounds = array<i64: 1, 1>}, {transform_indices = @transform_7, window_bounds = array<i64: 1, 128>}]} {
    %c0 = arith.constant 0 : index
    %c0_0 = arith.constant 0 : index
    %0 = vector.load %arg1[%c0, %c0_0] : memref<128x11xf32, #tpu.memory_space<vmem>>, vector<128x11xf32>
    %c0_1 = arith.constant 0 : index
    %c0_2 = arith.constant 0 : index
    %1 = vector.load %arg2[%c0_1, %c0_2] : memref<11x64xf32, #tpu.memory_space<vmem>>, vector<11x64xf32>
    %cst = arith.constant dense<0.000000e+00> : vector<128x64xf32>
    %2 = tpu.matmul %0, %1, %cst {dimension_numbers = #tpu.dot_dimension_numbers<[1], [0], [0], [1], [0, 0, 1, 1], [], []>} : vector<128x11xf32>, vector<11x64xf32>, vector<128x64xf32> -> vector<128x64xf32>
    %c0_3 = arith.constant 0 : index
    %c0_4 = arith.constant 0 : index
    %3 = vector.load %arg3[%c0_3, %c0_4] : memref<1x64xf32, #tpu.memory_space<vmem>>, vector<1x64xf32>
    %4 = vector.broadcast %3 : vector<1x64xf32> to vector<128x64xf32>
    %5 = arith.addf %2, %4 : vector<128x64xf32>
    %cst_5 = arith.constant 0.000000e+00 : f32
    %6 = vector.broadcast %cst_5 : f32 to vector<128x64xf32>
    %7 = arith.maximumf %5, %6 : vector<128x64xf32>
    %c0_6 = arith.constant 0 : index
    %c0_7 = arith.constant 0 : index
    %8 = vector.load %arg4[%c0_6, %c0_7] : memref<64x64xf32, #tpu.memory_space<vmem>>, vector<64x64xf32>
    %cst_8 = arith.constant dense<0.000000e+00> : vector<128x64xf32>
    %9 = tpu.matmul %7, %8, %cst_8 {dimension_numbers = #tpu.dot_dimension_numbers<[1], [0], [0], [1], [0, 0, 1, 1], [], []>} : vector<128x64xf32>, vector<64x64xf32>, vector<128x64xf32> -> vector<128x64xf32>
    %c0_9 = arith.constant 0 : index
    %c0_10 = arith.constant 0 : index
    %10 = vector.load %arg5[%c0_9, %c0_10] : memref<1x64xf32, #tpu.memory_space<vmem>>, vector<1x64xf32>
    %11 = vector.broadcast %10 : vector<1x64xf32> to vector<128x64xf32>
    %12 = arith.addf %9, %11 : vector<128x64xf32>
    %cst_11 = arith.constant 0.000000e+00 : f32
    %13 = vector.broadcast %cst_11 : f32 to vector<128x64xf32>
    %14 = arith.maximumf %12, %13 : vector<128x64xf32>
    %c0_12 = arith.constant 0 : index
    %c0_13 = arith.constant 0 : index
    %15 = vector.load %arg6[%c0_12, %c0_13] : memref<1x64xf32, #tpu.memory_space<vmem>>, vector<1x64xf32>
    %cst_14 = arith.constant dense<0.000000e+00> : vector<1x128xf32>
    %16 = tpu.matmul %15, %14, %cst_14 {dimension_numbers = #tpu.dot_dimension_numbers<[1], [1], [0], [0], [0, 0, 1, 0], [], []>} : vector<1x64xf32>, vector<128x64xf32>, vector<1x128xf32> -> vector<1x128xf32>
    %c0_15 = arith.constant 0 : index
    %c0_16 = arith.constant 0 : index
    %17 = memref.load %arg7[%c0_15, %c0_16] : memref<1x1xf32, #tpu.memory_space<smem>>
    %18 = vector.broadcast %17 : f32 to vector<1x128xf32>
    %19 = arith.addf %16, %18 : vector<1x128xf32>
    %c0_17 = arith.constant 0 : index
    %c0_18 = arith.constant 0 : index
    %20 = vector.load %arg8[%c0_17, %c0_18] : memref<1x128xf32, #tpu.memory_space<vmem>>, vector<1x128xf32>
    tpu.vector_store %arg8[%c0_17, %c0_18], %19 {strides = array<i32>} : memref<1x128xf32, #tpu.memory_space<vmem>>, vector<1x128xf32>,
    return
  }
  func.func @transform_0(%arg0: i32) -> (i32, i32) {
    %c0_i32 = arith.constant 0 : i32
    %c0_i32_0 = arith.constant 0 : i32
    return %arg0, %c0_i32 : i32, i32
  }
  func.func @transform_1(%arg0: i32) -> (i32, i32) {
    %c0_i32 = arith.constant 0 : i32
    %c0_i32_0 = arith.constant 0 : i32
    %c0_i32_1 = arith.constant 0 : i32
    return %c0_i32, %c0_i32_0 : i32, i32
  }
  func.func @transform_2(%arg0: i32) -> (i32, i32) {
    %c0_i32 = arith.constant 0 : i32
    %c0_i32_0 = arith.constant 0 : i32
    %c0_i32_1 = arith.constant 0 : i32
    return %c0_i32, %c0_i32_0 : i32, i32
  }
  func.func @transform_3(%arg0: i32) -> (i32, i32) {
    %c0_i32 = arith.constant 0 : i32
    %c0_i32_0 = arith.constant 0 : i32
    %c0_i32_1 = arith.constant 0 : i32
    return %c0_i32, %c0_i32_0 : i32, i32
  }
  func.func @transform_4(%arg0: i32) -> (i32, i32) {
    %c0_i32 = arith.constant 0 : i32
    %c0_i32_0 = arith.constant 0 : i32
    %c0_i32_1 = arith.constant 0 : i32
    return %c0_i32, %c0_i32_0 : i32, i32
  }
  func.func @transform_5(%arg0: i32) -> (i32, i32) {
    %c0_i32 = arith.constant 0 : i32
    %c0_i32_0 = arith.constant 0 : i32
    %c0_i32_1 = arith.constant 0 : i32
    return %c0_i32, %c0_i32_0 : i32, i32
  }
  func.func @transform_6(%arg0: i32) -> (i32, i32) {
    %c0_i32 = arith.constant 0 : i32
    %c0_i32_0 = arith.constant 0 : i32
    %c0_i32_1 = arith.constant 0 : i32
    return %c0_i32, %c0_i32_0 : i32, i32
  }
  func.func @transform_7(%arg0: i32) -> (i32, i32) {
    %c0_i32 = arith.constant 0 : i32
    %c0_i32_0 = arith.constant 0 : i32
    return %c0_i32, %arg0 : i32, i32
  }
}

</mosaic_0001>

<bundles_post_ra>
// kernel: tpu_custom_call.1
= control target key start
LH: loop header
LB: loop body
LE: loop exit
PB: predicated region body
PF: predicated region fallthrough
CT: control target
= control target key end

     0   :  { %13 = vsyncpa [#allocation4], 0  ;;  %s1236_s0 = inlined_call_operand.hbm [shape: f32[8,11], index: 0, kind: input, shape index: {}]   ;;  %s1237_s1 = inlined_call_operand.hbm [shape: f32[11,64], index: 1, kind: input, shape index: {}]   ;;  %s1238_s2 = inlined_call_operand.vmem [shape: f32[1,64], index: 2, kind: input, shape index: {}]   ;;  %s1239_s3 = inlined_call_operand.hbm [shape: f32[64,64], index: 3, kind: input, shape index: {}]   ;;  %s1240_s4 = inlined_call_operand.vmem [shape: f32[1,64], index: 4, kind: input, shape index: {}]   ;;  %s1241_s5 = inlined_call_operand.vmem [shape: f32[1,64], index: 5, kind: input, shape index: {}]   ;;  %s1242_s6 = inlined_call_operand.<no memory space> [shape: f32[1,1], index: 6, kind: input, shape index: {}]   ;;  %s1243_s7 = inlined_call_operand.hbm [shape: f32[1,8], index: 7, kind: output, shape index: {}]  }
   0x1   :  { %14 = vsyncpa [#allocation7], 0 }
   0x2   :  { %15 = vsyncpa [#allocation5], 0 }
   0x3   :  { %20 = vsyncadd [#allocation4], 1920  ;;  %s1046_s24 = smov [#allocation6]   ;;  %s1047_s26 = smov [#allocation3]  }
   0x4   :  { %s33_s25 = sshll.u32 %s1046_s24, 4  ;;  %s21_s27 = sshll.u32 %s1047_s26, 4  ;;  %s34_s25 = int_to_ptr.vmem [resolvable:$true] %s33_s25  ;;  %s1096_s27 = int_to_ptr.vmem [resolvable:$true] %s21_s27 }
   0x5   :  { %s952_s30 = scalar_lea.hbm %s1237_s1, 256 }
   0x6   :  { %p953_p0 = scmp.ne.s32.totalorder %s1237_s1, %s952_s30  ;;  %p956_p1 = scmp.lt.u32.totalorder %s952_s30, %s1237_s1 }
   0x8   :  { %p958_p2 = pnand %p956_p1, %p953_p0 }
   0xa   :  { %961 = shalt.err (!%p958_p2)
}
   0xb   :  { %s962_s12 = scalar_lea.vmem %s34_s25, 256  ;;  %p967_p4 = scmp.lt.s32.totalorder %s34_s25, %s34_s25 }
   0xc   :  { %p963_p3 = scmp.ne.s32.totalorder %s34_s25, %s962_s12  ;;  %p968_p5 = scmp.lt.s32.totalorder %s962_s12, %s962_s12 }
   0xe   :  { %p969_p6 = por %p968_p5, %p967_p4 }
  0x10   :  { %p970_p7 = pnand %p969_p6, %p963_p3 }
  0x12   :  { %973 = shalt.err (!%p970_p7)
}
  0x13   :  { %s1048_s13 = smov 128   ;;  %s1049_s14 = smov 8  }
  0x14   :  { %39 = dma.hbm_to_vmem [thread:$0]  %s1237_s1, 256, %s34_s25, [#allocation7], %s1048_s13, %s1048_s13, %s1049_s14  }
  0x15   :  { %s974_s19 = scalar_lea.hbm %s1236_s0, 128 }
  0x16   :  { %p975_p8 = scmp.ne.s32.totalorder %s1236_s0, %s974_s19  ;;  %p978_p9 = scmp.lt.u32.totalorder %s974_s19, %s1236_s0 }
  0x18   :  { %p980_p10 = pnand %p978_p9, %p975_p8 }
  0x1a   :  { %983 = shalt.err (!%p980_p10)
}
  0x1b   :  { %s984_s24 = scalar_lea.vmem %s1096_s27, 128  ;;  %s988_s1 = scalar_lea.vmem %s1096_s27, 2048 }
  0x1c   :  { %p985_p11 = scmp.ne.s32.totalorder %s1096_s27, %s984_s24  ;;  %p989_p12 = scmp.lt.s32.totalorder %s1096_s27, %s1096_s27 }
  0x1d   :  { %p990_p13 = scmp.lt.s32.totalorder %s988_s1, %s984_s24 }
  0x1f   :  { %p991_p0 = por %p990_p13, %p989_p12 }
  0x21   :  { %p992_p1 = pnand %p991_p0, %p985_p11 }
  0x23   :  { %995 = shalt.err (!%p992_p1)
}
  0x24   :  { %27 = dma.hbm_to_vmem [thread:$0]  %s1236_s0, 128, %s1096_s27, [#allocation4], %s1048_s13, %s1048_s13, %s1049_s14  }
  0x25   :  { %s1050_s28 = smov [#allocation8]   ;;  %s996_s9 = scalar_lea.hbm %s1239_s3, 1024 }
  0x26   :  { %s47_s29 = sshll.u32 %s1050_s28, 4  ;;  %p997_p2 = scmp.ne.s32.totalorder %s1239_s3, %s996_s9  ;;  %s48_s29 = int_to_ptr.vmem [resolvable:$true] %s47_s29 }
  0x27   :  { %p1000_p3 = scmp.lt.u32.totalorder %s996_s9, %s1239_s3 }
  0x29   :  { %p1002_p4 = pnand %p1000_p3, %p997_p2 }
  0x2b   :  { %1005 = shalt.err (!%p1002_p4)
}
  0x2c   :  { %s1006_s16 = scalar_lea.vmem %s48_s29, 1024  ;;  %p1011_p6 = scmp.lt.s32.totalorder %s48_s29, %s48_s29 }
  0x2d   :  { %p1007_p5 = scmp.ne.s32.totalorder %s48_s29, %s1006_s16  ;;  %p1012_p7 = scmp.lt.s32.totalorder %s1006_s16, %s1006_s16 }
  0x2f   :  { %p1013_p8 = por %p1012_p7, %p1011_p6 }
  0x31   :  { %p1014_p9 = pnand %p1013_p8, %p1007_p5 }
  0x33   :  { %1017 = shalt.err (!%p1014_p9)
}
  0x34   :  { %53 = dma.hbm_to_vmem [thread:$0]  %s1239_s3, 1024, %s48_s29, [#allocation7], %s1048_s13, %s1048_s13, %s1049_s14  }
  0x35   :  { %1040 = dma.done.wait [#allocation4], 2048  }
  0x36   :  { %1041 = vsyncadd [#allocation4], 4294965248 }
  0x37   :  { %1042 = dma.done.wait [#allocation7], 1280  }
  0x38   :  { %1043 = vsyncadd [#allocation7], 4294966016  ;;  %vm143_vm0 = vcmask 1042432   ;;  %vm94_vm1 = vcmask 89088   ;;  %vm1051_vm2 = vmmov 1   ;;  %v85_v0 = vld [vmem:[#allocation6] sm:$0xff] }
  0x39   :  { %vm889_vm3 = vmpackc.low %vm143_vm0, %vm1051_vm2  ;;  %v86_v1 = vld [vmem:[#allocation6 + $0x8] sm:$0x7]  ;;  %v69_v2 = vld [vmem:[#allocation3] sm:$0xff]  ;;  %vm323_vm4 = vcmask 523264   ;;  %vm1053_vm5 = vmmov 0   ;;  %s1055_s20 = smov [#allocation9]  }
  0x3a   :  { %v888_v3 = vpack.c.bf16 %v86_v1, %v85_v0  ;;  %789 = vmatprep.mubr.msk.f32.mxu1 %vm94_vm1, %v69_v2  ;;  %v70_v4 = vld [vmem:[#allocation3 + $0x8] sm:$0xff]  ;;  %v71_v5 = vld [vmem:[#allocation3 + $0x10] sm:$0xff]  ;;  %v309_v7 = vld [vmem:[#allocation8 + $0x8] sm:$0xff]  ;;  %s664_s21 = sshll.u32 %s1055_s20, 4  ;;  %s665_s21 = int_to_ptr.vmem [resolvable:$true] %s664_s21 }
  0x3b   :  { %v308_v6 = vld [vmem:[#allocation8] sm:$0xff]  ;;  %v310_v8 = vld [vmem:[#allocation8 + $0x10] sm:$0xff]  ;;  %v311_v10 = vld [vmem:[#allocation8 + $0x18] sm:$0xff]  ;;  %s1018_s22 = scalar_lea.vmem %s665_s21, 16  ;;  %s1022_s23 = scalar_lea.vmem %s665_s21, 32 }
  0x3c   :  { %890 = vmatprep.subr.msk.bf16.mxu1 %vm889_vm3, %v888_v3  ;;  %v894_v9 = vpack.c.bf16 %v309_v7, %v308_v6  ;;  %v72_v11 = vld [vmem:[#allocation3 + $0x18] sm:$0xff]  ;;  %v898_v12 = vpack.c.bf16 %v311_v10, %v310_v8  ;;  %v312_v13 = vld [vmem:[#allocation8 + $0x20] sm:$0xff]  ;;  %v73_v15 = vld [vmem:[#allocation3 + $0x20] sm:$0xff]  ;;  %p1019_p10 = scmp.ne.s32.totalorder %s665_s21, %s1018_s22  ;;  %p1023_p11 = scmp.lt.s32.totalorder %s665_s21, %s665_s21 }
  0x3d   :  { %893 = vmatpush3.bf16.msk.msra.mxu1 %vm889_vm3, %v888_v3  ;;  %v313_v14 = vld [vmem:[#allocation8 + $0x28] sm:$0xff]  ;;  %v74_v17 = vld [vmem:[#allocation3 + $0x28] sm:$0xff]  ;;  %v314_v18 = vld [vmem:[#allocation8 + $0x30] sm:$0xff]  ;;  %p1024_p12 = scmp.lt.s32.totalorder %s1022_s23, %s1018_s22 }
  0x3e   :  { %895 = vmatprep.subr.bf16.mxu1 %v894_v9  ;;  %v902_v16 = vpack.c.bf16 %v313_v14, %v312_v13  ;;  %v315_v19 = vld [vmem:[#allocation8 + $0x38] sm:$0xff]  ;;  %v75_v20 = vld [vmem:[#allocation3 + $0x30] sm:$0xff]  ;;  %v76_v22 = vld [vmem:[#allocation3 + $0x38] sm:$0xff] }
  0x3f   :  { %v906_v21 = vpack.c.bf16 %v315_v19, %v314_v18  ;;  %v77_v23 = vld [vmem:[#allocation3 + $0x40] sm:$0xff]  ;;  %v78_v24 = vld [vmem:[#allocation3 + $0x48] sm:$0xff]  ;;  %v79_v25 = vld [vmem:[#allocation3 + $0x50] sm:$0xff]  ;;  %p1025_p13 = por %p1024_p12, %p1023_p11 }
  0x40   :  { %790 = vmatmul.mubr.msk.f32.vlgmr.msra.gmra.mrb[0].mxu1 %vm94_vm1, %v70_v4  ;;  %v80_v26 = vld [vmem:[#allocation3 + $0x58] sm:$0xff]  ;;  %v81_v27 = vld [vmem:[#allocation3 + $0x60] sm:$0xff]  ;;  %v82_v28 = vld [vmem:[#allocation3 + $0x68] sm:$0xff] }
  0x41   :  { %792 = vmatprep.mubr.msk.f32.mxu1 %vm94_vm1, %v71_v5  ;;  %897 = vmatpush3.bf16.msra.mxu1 %v894_v9  ;;  %v83_v29 = vld [vmem:[#allocation3 + $0x70] sm:$0xff]  ;;  %v84_v30 = vld [vmem:[#allocation3 + $0x78] sm:$0xff]  ;;  %v674_v31 = vld [vmem:[%s1238_s2] ss:$0 sm:$0xff]  ;;  %p1026_p0 = pnand %p1025_p13, %p1019_p10 }
  0x42   :  { %899 = vmatprep.subr.bf16.mxu1 %v898_v12  ;;  %v692_v18 = vld [vmem:[%s1240_s4] ss:$0 sm:$0xff]  ;;  %vm1190_vm6 = vmpackc.low %vm323_vm4, %vm323_vm4 }
  0x44   :  { %793 = vmatmul.mubr.msk.f32.gmra.mrb[2].mxu1 %vm94_vm1, %v72_v11 }
  0x45   :  { %795 = vmatprep.mubr.msk.f32.mxu1 %vm94_vm1, %v73_v15  ;;  %901 = vmatpush3.bf16.msra.mxu1 %v898_v12 }
  0x46   :  { %903 = vmatprep.subr.bf16.mxu1 %v902_v16 }
  0x48   :  { %796 = vmatmul.mubr.msk.f32.gmra.mrb[4].mxu1 %vm94_vm1, %v74_v17  ;;  %v1054_v17 = vmov 0.0  }
  0x49   :  { %798 = vmatprep.mubr.msk.f32.mxu1 %vm94_vm1, %v75_v20  ;;  %905 = vmatpush3.bf16.msra.mxu1 %v902_v16  ;;  %v1052_v16 = vmov 0.0|0.0  }
  0x4a   :  { %907 = vmatprep.subr.bf16.mxu1 %v906_v21  ;;  %910 = vmatprep.subr.bf16.mxu0 %v1052_v16 }
  0x4b   :  { %885 = vmatprep.mubr.msk.f32.mxu0 %vm1053_vm5, %v1054_v17 }
  0x4c   :  { %799 = vmatmul.mubr.msk.f32.gmra.mrb[6].mxu1 %vm94_vm1, %v76_v22 }
  0x4d   :  { %801 = vmatprep.mubr.msk.f32.mxu1 %vm94_vm1, %v77_v23  ;;  %909 = vmatpush3.bf16.msra.mxu1 %v906_v21 }
  0x50   :  { %802 = vmatmul.mubr.msk.f32.gmra.mrb[8].mxu1 %vm94_vm1, %v78_v24 }
  0x51   :  { %804 = vmatprep.mubr.msk.f32.mxu1 %vm94_vm1, %v79_v25 }
  0x54   :  { %805 = vmatmul.mubr.msk.f32.gmra.mrb[10].mxu1 %vm94_vm1, %v80_v26 }
  0x55   :  { %807 = vmatprep.mubr.msk.f32.mxu1 %vm94_vm1, %v81_v27 }
  0x58   :  { %808 = vmatmul.mubr.msk.f32.gmra.mrb[12].mxu1 %vm94_vm1, %v82_v28 }
  0x59   :  { %810 = vmatprep.mubr.msk.f32.mxu1 %vm94_vm1, %v83_v29 }
  0x5c   :  { %811 = vmatmul.mubr.msk.f32.gmra.mrb[14].mxu1 %vm94_vm1, %v84_v30 }
 0x113   :  { %v791_v32 = vpop.f32.mrb[0].mxu1 }
 0x114   :  { %v219_v33 = vadd.f32 %v791_v32, %v674_v31  ;;  %v213_v34 = vpop.f32.mrb[1].mxu1 }
 0x115   :  { %v214_v35 = vadd.f32 %v674_v31, %v213_v34 }
 0x116   :  { %v293_v38 = vmax.f32 %v219_v33, 0.0 }
 0x117   :  { %v292_v36 = vmax.f32 %v214_v35, 0.0  ;;  %v794_v37 = vpop.f32.mrb[2].mxu1 }
 0x118   :  { %v229_v39 = vadd.f32 %v794_v37, %v674_v31  ;;  %v223_v40 = vpop.f32.mrb[3].mxu1 }
 0x119   :  { %v224_v41 = vadd.f32 %v674_v31, %v223_v40  ;;  %829 = vmatprep.mubr.msk.f32.mxu1 %vm323_vm4, %v292_v36 }
 0x11a   :  { %v295_v42 = vmax.f32 %v229_v39, 0.0  ;;  %830 = vmatmul.mubr.msk.f32.vlgmr.msra.gmra.mrb[16].mxu1 %vm323_vm4, %v293_v38 }
 0x11b   :  { %v294_v43 = vmax.f32 %v224_v41, 0.0  ;;  %v797_v44 = vpop.f32.mrb[4].mxu1 }
 0x11c   :  { %v239_v45 = vadd.f32 %v797_v44, %v674_v31  ;;  %v233_v46 = vpop.f32.mrb[5].mxu1 }
 0x11d   :  { %832 = vmatprep.mubr.msk.f32.mxu1 %vm323_vm4, %v294_v43  ;;  %v234_v47 = vadd.f32 %v674_v31, %v233_v46 }
 0x11e   :  { %833 = vmatmul.mubr.msk.f32.gmra.mrb[18].mxu1 %vm323_vm4, %v295_v42  ;;  %v297_v48 = vmax.f32 %v239_v45, 0.0 }
 0x11f   :  { %v296_v49 = vmax.f32 %v234_v47, 0.0  ;;  %v800_v50 = vpop.f32.mrb[6].mxu1 }
 0x120   :  { %v249_v51 = vadd.f32 %v800_v50, %v674_v31  ;;  %v243_v52 = vpop.f32.mrb[7].mxu1 }
 0x121   :  { %835 = vmatprep.mubr.msk.f32.mxu1 %vm323_vm4, %v296_v49  ;;  %v244_v53 = vadd.f32 %v674_v31, %v243_v52 }
 0x122   :  { %836 = vmatmul.mubr.msk.f32.gmra.mrb[20].mxu1 %vm323_vm4, %v297_v48  ;;  %v299_v54 = vmax.f32 %v249_v51, 0.0 }
 0x123   :  { %v298_v55 = vmax.f32 %v244_v53, 0.0  ;;  %v803_v56 = vpop.f32.mrb[8].mxu1 }
 0x124   :  { %v259_v57 = vadd.f32 %v803_v56, %v674_v31  ;;  %v253_v58 = vpop.f32.mrb[9].mxu1 }
 0x125   :  { %838 = vmatprep.mubr.msk.f32.mxu1 %vm323_vm4, %v298_v55  ;;  %v254_v59 = vadd.f32 %v674_v31, %v253_v58 }
 0x126   :  { %839 = vmatmul.mubr.msk.f32.gmra.mrb[22].mxu1 %vm323_vm4, %v299_v54  ;;  %v301_v60 = vmax.f32 %v259_v57, 0.0 }
 0x127   :  { %v300_v61 = vmax.f32 %v254_v59, 0.0  ;;  %v806_v62 = vpop.f32.mrb[10].mxu1 }
 0x128   :  { %v269_v63 = vadd.f32 %v806_v62, %v674_v31  ;;  %v263_v0 = vpop.f32.mrb[11].mxu1 }
 0x129   :  { %841 = vmatprep.mubr.msk.f32.mxu1 %vm323_vm4, %v300_v61  ;;  %v264_v1 = vadd.f32 %v674_v31, %v263_v0 }
 0x12a   :  { %842 = vmatmul.mubr.msk.f32.gmra.mrb[24].mxu1 %vm323_vm4, %v301_v60  ;;  %v303_v2 = vmax.f32 %v269_v63, 0.0 }
 0x12b   :  { %v302_v3 = vmax.f32 %v264_v1, 0.0  ;;  %v809_v4 = vpop.f32.mrb[12].mxu1 }
 0x12c   :  { %v279_v5 = vadd.f32 %v809_v4, %v674_v31  ;;  %v273_v6 = vpop.f32.mrb[13].mxu1 }
 0x12d   :  { %844 = vmatprep.mubr.msk.f32.mxu1 %vm323_vm4, %v302_v3  ;;  %v274_v7 = vadd.f32 %v674_v31, %v273_v6 }
 0x12e   :  { %845 = vmatmul.mubr.msk.f32.gmra.mrb[26].mxu1 %vm323_vm4, %v303_v2  ;;  %v305_v8 = vmax.f32 %v279_v5, 0.0 }
 0x12f   :  { %v304_v9 = vmax.f32 %v274_v7, 0.0  ;;  %v812_v10 = vpop.f32.mrb[14].mxu1 }
 0x130   :  { %v289_v11 = vadd.f32 %v812_v10, %v674_v31  ;;  %v283_v12 = vpop.f32.mrb[15].mxu1 }
 0x131   :  { %847 = vmatprep.mubr.msk.f32.mxu1 %vm323_vm4, %v304_v9  ;;  %v284_v13 = vadd.f32 %v674_v31, %v283_v12  ;;  %v533_v12 = vld [vmem:[%s1241_s5] sm:$0x1] }
 0x132   :  { %848 = vmatmul.mubr.msk.f32.gmra.mrb[28].mxu1 %vm323_vm4, %v305_v8  ;;  %v307_v14 = vmax.f32 %v289_v11, 0.0 }
 0x133   :  { %v306_v15 = vmax.f32 %v284_v13, 0.0  ;;  %v535_v13 = vstv %s1242_s6 }
 0x135   :  { %850 = vmatprep.mubr.msk.f32.mxu1 %vm323_vm4, %v306_v15 }
 0x136   :  { %851 = vmatmul.mubr.msk.f32.gmra.mrb[30].mxu1 %vm323_vm4, %v307_v14 }
 0x1ed   :  { %v831_v19 = vpop.f32.mrb[16].mxu1 }
 0x1ee   :  { %v444_v20 = vadd.f32 %v831_v19, %v692_v18  ;;  %v438_v21 = vpop.f32.mrb[17].mxu1 }
 0x1ef   :  { %v439_v22 = vadd.f32 %v692_v18, %v438_v21 }
 0x1f0   :  { %v518_v23 = vmax.f32 %v444_v20, 0.0 }
 0x1f1   :  { %v517_v24 = vmax.f32 %v439_v22, 0.0  ;;  %v834_v25 = vpop.f32.mrb[18].mxu1 }
 0x1f2   :  { %v454_v26 = vadd.f32 %v834_v25, %v692_v18  ;;  %v448_v27 = vpop.f32.mrb[19].mxu1 }
 0x1f3   :  { %v911_v29 = vpack.c.bf16 %v518_v23, %v517_v24  ;;  %v449_v30 = vadd.f32 %v692_v18, %v448_v27 }
 0x1f4   :  { %v520_v31 = vmax.f32 %v454_v26, 0.0 }
 0x1f5   :  { %v519_v32 = vmax.f32 %v449_v30, 0.0  ;;  %913 = vmatpush3.bf16.xpose.msk.msra.mxu0 %vm1190_vm6, %v911_v29  ;;  %v837_v33 = vpop.f32.mrb[20].mxu1 }
 0x1f6   :  { %v464_v34 = vadd.f32 %v837_v33, %v692_v18  ;;  %v458_v35 = vpop.f32.mrb[21].mxu1  ;;  %914 = vmatprep.subr.bf16.mxu0 %v1052_v16 }
 0x1f7   :  { %v915_v36 = vpack.c.bf16 %v520_v31, %v519_v32  ;;  %v459_v37 = vadd.f32 %v692_v18, %v458_v35 }
 0x1f8   :  { %v522_v38 = vmax.f32 %v464_v34, 0.0 }
 0x1f9   :  { %v521_v39 = vmax.f32 %v459_v37, 0.0  ;;  %v840_v40 = vpop.f32.mrb[22].mxu1 }
 0x1fa   :  { %v474_v41 = vadd.f32 %v840_v40, %v692_v18  ;;  %v468_v42 = vpop.f32.mrb[23].mxu1 }
 0x1fb   :  { %v919_v43 = vpack.c.bf16 %v522_v38, %v521_v39  ;;  %v469_v44 = vadd.f32 %v692_v18, %v468_v42 }
 0x1fc   :  { %v524_v45 = vmax.f32 %v474_v41, 0.0 }
 0x1fd   :  { %917 = vmatpush3.bf16.xpose.msk.msra.mxu0 %vm1190_vm6, %v915_v36  ;;  %v523_v46 = vmax.f32 %v469_v44, 0.0  ;;  %v843_v47 = vpop.f32.mrb[24].mxu1 }
 0x1fe   :  { %918 = vmatprep.subr.bf16.mxu0 %v1052_v16  ;;  %v484_v48 = vadd.f32 %v843_v47, %v692_v18  ;;  %v478_v49 = vpop.f32.mrb[25].mxu1 }
 0x1ff   :  { %v923_v50 = vpack.c.bf16 %v524_v45, %v523_v46  ;;  %v479_v51 = vadd.f32 %v692_v18, %v478_v49 }
 0x200   :  { %v526_v52 = vmax.f32 %v484_v48, 0.0 }
 0x201   :  { %v525_v53 = vmax.f32 %v479_v51, 0.0  ;;  %v846_v54 = vpop.f32.mrb[26].mxu1 }
 0x202   :  { %v494_v55 = vadd.f32 %v846_v54, %v692_v18  ;;  %v488_v56 = vpop.f32.mrb[27].mxu1 }
 0x203   :  { %v927_v57 = vpack.c.bf16 %v526_v52, %v525_v53  ;;  %v489_v58 = vadd.f32 %v692_v18, %v488_v56 }
 0x204   :  { %v528_v59 = vmax.f32 %v494_v55, 0.0 }
 0x205   :  { %921 = vmatpush3.bf16.xpose.msk.msra.mxu0 %vm1190_vm6, %v919_v43  ;;  %v527_v60 = vmax.f32 %v489_v58, 0.0  ;;  %v849_v61 = vpop.f32.mrb[28].mxu1 }
 0x206   :  { %922 = vmatprep.subr.bf16.mxu0 %v1052_v16  ;;  %v504_v62 = vadd.f32 %v849_v61, %v692_v18  ;;  %v498_v63 = vpop.f32.mrb[29].mxu1 }
 0x207   :  { %v931_v0 = vpack.c.bf16 %v528_v59, %v527_v60  ;;  %v499_v1 = vadd.f32 %v692_v18, %v498_v63 }
 0x208   :  { %v530_v2 = vmax.f32 %v504_v62, 0.0 }
 0x209   :  { %v529_v3 = vmax.f32 %v499_v1, 0.0  ;;  %v852_v4 = vpop.f32.mrb[30].mxu1 }
 0x20a   :  { %v514_v5 = vadd.f32 %v852_v4, %v692_v18  ;;  %v508_v6 = vpop.f32.mrb[31].mxu1 }
 0x20b   :  { %v935_v7 = vpack.c.bf16 %v530_v2, %v529_v3  ;;  %v509_v8 = vadd.f32 %v692_v18, %v508_v6 }
 0x20c   :  { %v532_v9 = vmax.f32 %v514_v5, 0.0 }
 0x20d   :  { %925 = vmatpush3.bf16.xpose.msk.msra.mxu0 %vm1190_vm6, %v923_v50  ;;  %v531_v10 = vmax.f32 %v509_v8, 0.0 }
 0x20e   :  { %926 = vmatprep.subr.bf16.mxu0 %v1052_v16 }
 0x20f   :  { %v939_v11 = vpack.c.bf16 %v532_v9, %v531_v10 }
 0x215   :  { %929 = vmatpush3.bf16.xpose.msk.msra.mxu0 %vm1190_vm6, %v927_v57 }
 0x216   :  { %930 = vmatprep.subr.bf16.mxu0 %v1052_v16 }
 0x21d   :  { %933 = vmatpush3.bf16.xpose.msk.msra.mxu0 %vm1190_vm6, %v931_v0 }
 0x21e   :  { %934 = vmatprep.subr.bf16.mxu0 %v1052_v16 }
 0x225   :  { %937 = vmatpush3.bf16.xpose.msk.msra.mxu0 %vm1190_vm6, %v935_v7 }
 0x226   :  { %938 = vmatprep.subr.bf16.mxu0 %v1052_v16 }
 0x22d   :  { %941 = vmatpush3.bf16.xpose.msk.msra.mxu0 %vm1190_vm6, %v939_v11 }
 0x234   :  { %886 = vmatmul.mubr.msk.f32.vlgmr.msra.gmra.mrb[0].mxu0 %vm323_vm4, %v533_v12 }
 0x307   :  { %v653_v14 = vpop.f32.mrb[0].mxu0 }
 0x308   :  { %v654_v15 = vadd.f32 %v653_v14, %v535_v13  ;;  %v887_v17 = vpop.f32.mrb[1].mxu0 }
 0x30a   :  { %657 = vst [vmem:[#allocation9] sm:$0x1] %v654_v15 }
 0x30b   :  { %1029 = shalt.err (!%p1026_p0)
}
 0x30c   :  { %s1030_s1 = scalar_lea.hbm %s1243_s7, 16 }
 0x30d   :  { %p1031_p1 = scmp.ne.s32.totalorder %s1243_s7, %s1030_s1  ;;  %p1034_p2 = scmp.lt.u32.totalorder %s1030_s1, %s1243_s7 }
 0x30f   :  { %p1036_p3 = pnand %p1034_p2, %p1031_p1 }
 0x311   :  { %1039 = shalt.err (!%p1036_p3)
}
 0x312   :  { %667 = dma.vmem_to_hbm [thread:$0]  %s665_s21, 16, %s1243_s7, [#allocation5]  }
 0x313   :  { %1044 = dma.done.wait [#allocation5], 16  }
 0x314   :  { %1045 = vsyncadd [#allocation5], 4294967280 }
 0x315   :  { %671 = vsyncpa [#allocation4], 1 }
 0x316   :  { %672 = vsyncpa [#allocation7], 1 }
 0x317   :  { %673 = vsyncpa [#allocation5], 1 }

</bundles_post_ra>
